<compile_context>
chip_gen: v5e
topology: v5e:2x2
jax: 0.10.0
libtpu: 0.0.40
codegen_flags: <defaults>
</compile_context>

<pallas_src>
import math

import jax
import jax.numpy as jnp
from jax.experimental import pallas as pl
from jax.experimental.pallas import tpu as pltpu


def _build_positional_table(embed_size: int, max_seq_length: int,
                            dtype=jnp.float32) -> jnp.ndarray:
    """Replicates the PyTorch __init__ buffer construction exactly."""
    # Odd embed_size would also break the PyTorch module (shape mismatch on
    # the cos assignment), so make the constraint explicit here.
    assert embed_size % 2 == 0, "embed_size must be even"
    position = jnp.arange(max_seq_length, dtype=jnp.float32)[:, None]         # (L, 1)
    div_term = jnp.exp(
        jnp.arange(0, embed_size, 2, dtype=jnp.float32)
        * (-math.log(1000.0) / embed_size)   # NOTE: log(1000.0), matching the module
    )                                                                          # (E/2,)
    angles = position * div_term                                               # (L, E/2)
    pe = jnp.zeros((max_seq_length, embed_size), dtype=jnp.float32)
    pe = pe.at[:, 0::2].set(jnp.sin(angles))
    pe = pe.at[:, 1::2].set(jnp.cos(angles))
    # Store in the model dtype once at init -> no per-call cast pass over HBM.
    return pe.astype(dtype)


def _add_pe_kernel(x_ref, pe_ref, o_ref):
    # Batch dim is Squeezed out of the x/out blocks: all refs are (TR, C).
    # One VPU vadd per vreg; any pe dtype cast happens in-register here
    # (never as a separate un-pipelined XLA pass in the wrapper).
    o_ref[...] = x_ref[...] + pe_ref[...].astype(o_ref.dtype)


def _chip_budget():
    """Per-generation (per-block byte budget, explicit vmem_limit_bytes | None)."""
    kind = ""
    try:
        kind = jax.devices()[0].device_kind.lower()
    except Exception:
        pass
    if "v5 lite" in kind or "v5e" in kind or "v5lite" in kind:
        # v5e: 16 MiB default scoped VMEM; ~1.5 MiB blocks -> ~9 MiB footprint,
        # and at ~0.8 TB/s the per-step overhead is already <5%.
        return 3 * 512 * 1024, None
    if "v6" in kind:
        # v6e: 4 MiB blocks -> ~24 MiB double-buffered, fits 32 MiB default.
        return 4 * 1024 * 1024, None
    if "7" in kind:
        # v7x: bigger tiles amortize per-step overhead at 3.2 TB/s; ~30 MiB
        # footprint needs an explicit limit (64 MiB physical per TC).
        return 5 * 1024 * 1024, 40 * 1024 * 1024
    # Unknown chip: conservative budget that fits every generation's default.
    return 2 * 1024 * 1024, None


def sinusoidal_positional_encoding(
    x: jnp.ndarray,
    pe: jnp.ndarray,
    *,
    target_block_bytes: int | None = None,
    vmem_limit_bytes: int | None = None,
    alias_input: bool = False,
) -> jnp.ndarray:
    """x: (B, S, E); pe: (max_seq_length, E).  Returns x + pe[:S, :] (broadcast over B)."""
    B, S, E = x.shape
    assert pe.shape[0] >= S and pe.shape[1] == E
    pe_slice = pe[:S, :]   # no dtype cast here; folded into the kernel if needed

    auto_block, auto_vmem = _chip_budget()
    block_bytes = target_block_bytes if target_block_bytes is not None else auto_block
    vmem_limit = vmem_limit_bytes if vmem_limit_bytes is not None else auto_vmem

    # ---- Pick a lane-dense 2D view (R, C) of the per-batch (S, E) plane. ----
    needs_unpad = False
    flat = S * E
    if E % 128 == 0:
        R, C = S, E
        x2, pe2 = x, pe_slice
    elif flat % 128 == 0:
        # Flatten + refold so the last dim is exactly 128 lanes (unmasked vst).
        R, C = flat // 128, 128
        x2 = x.reshape(B, R, C)
        pe2 = pe_slice.reshape(R, C)
    else:
        # Flatten and pad by <= 127 elements to the next multiple of 128, then
        # run the lane-dense path and slice the result back afterwards.
        flat_pad = pl.cdiv(flat, 128) * 128
        R, C = flat_pad // 128, 128
        x2 = jnp.pad(x.reshape(B, flat), ((0, 0), (0, flat_pad - flat))).reshape(B, R, C)
        pe2 = jnp.pad(pe_slice.reshape(flat), (0, flat_pad - flat)).reshape(R, C)
        needs_unpad = True

    # ---- Tile the R axis against the per-block VMEM budget. ----
    itemsize = jnp.dtype(x.dtype).itemsize
    sub = max(8, 32 // itemsize)          # dtype-aware sublane multiple: 8/16/32
    tr = max(1, block_bytes // (C * itemsize))
    if tr >= R:
        TR = R                            # full extent -> always a legal block dim
    else:
        TR = max(sub, (tr // sub) * sub)  # interior blocks: sublane-aligned

    # Guarantee >= 2 grid steps when possible so v7x can shard across its two
    # TensorCores (harmless on single-TC v5e/v6e).
    if B * pl.cdiv(R, TR) < 2 and R > sub:
        TR = min(R, ((-(-R // 2) + sub - 1) // sub) * sub)

    grid = (pl.cdiv(R, TR), B)            # S-tiles outer, batch inner

    cp_kwargs = dict(dimension_semantics=("parallel", "parallel"))
    if vmem_limit is not None:
        cp_kwargs["vmem_limit_bytes"] = int(vmem_limit)

    call_kwargs = {}
    if alias_input:
        # x2 -> out2; saves a second B*S*E HBM allocation when x is donated.
        call_kwargs["input_output_aliases"] = {0: 0}

    out2 = pl.pallas_call(
        _add_pe_kernel,
        out_shape=jax.ShapeDtypeStruct((B, R, C), x.dtype),
        grid_spec=pltpu.PrefetchScalarGridSpec(
            num_scalar_prefetch=0,
            grid=grid,
            in_specs=[
                # x: batch squeezed; block index follows (b, s_tile).
                pl.BlockSpec((pl.Squeezed(), TR, C), lambda s, b: (b, s, 0)),
                # pe: constant block index along the inner (batch) axis, so the
                # pipeline reuses the resident tile instead of re-DMAing it B times.
                pl.BlockSpec((TR, C), lambda s, b: (s, 0)),
            ],
            out_specs=pl.BlockSpec((pl.Squeezed(), TR, C), lambda s, b: (b, s, 0)),
        ),
        compiler_params=pltpu.CompilerParams(**cp_kwargs),
        **call_kwargs,
    )(x2, pe2)

    if needs_unpad:
        return out2.reshape(B, R * C)[:, :flat].reshape(B, S, E)
    return out2.reshape(B, S, E)


def _check(batch, seq, embed, max_seq_length, key, dtype=jnp.float32,
           atol=1e-6, rtol=1e-6, **kw):
    x = jax.random.normal(key, (batch, seq, embed), dtype=jnp.float32).astype(dtype)
    pe = _build_positional_table(embed_size=embed, max_seq_length=max_seq_length,
                                 dtype=dtype)
    # Reference computed before the kernel call (safe even with alias_input).
    ref = x + pe[:seq, :][None, :, :]
    out = jax.block_until_ready(sinusoidal_positional_encoding(x, pe, **kw))
    assert out.shape == (batch, seq, embed) and out.dtype == x.dtype
    assert jnp.allclose(out.astype(jnp.float32), ref.astype(jnp.float32),
                        atol=atol, rtol=rtol), \
        f"mismatch vs reference for {(batch, seq, embed, dtype)}"


if __name__ == "__main__":
    key = jax.random.PRNGKey(0)
    k0, k1, k2, k3, k4 = jax.random.split(key, 5)

    # Primary small shape consistent with the module's forward: (batch, seq, embed).
    _check(batch=2, seq=8, embed=32, max_seq_length=16, key=k0)

    # Exercise the multi-tile pipelined path (tiny block budget forces TR < R).
    _check(batch=2, seq=32, embed=64, max_seq_length=64, key=k1,
           target_block_bytes=8 * 128 * 4)

    # Exercise the flatten + pad-to-128 lane-dense path (S*E not a multiple of 128).
    _check(batch=2, seq=6, embed=20, max_seq_length=16, key=k2)

    # bf16 path: dtype-aware sublane rounding (TR becomes a multiple of 16).
    _check(batch=1, seq=64, embed=128, max_seq_length=64, key=k3,
           dtype=jnp.bfloat16, atol=1e-2, rtol=1e-2,
           target_block_bytes=16 * 128 * 2)

    # Single-batch shape: megacore split (>= 2 grid steps) + x -> out aliasing.
    _check(batch=1, seq=16, embed=128, max_seq_length=32, key=k4, alias_input=True)

    print("KERNEL_OK")
</pallas_src>

<mosaic_0001>
module attributes {stable_mosaic.version = 11 : i64} {
  func.func @_add_pe_kernel(%arg0: i32, %arg1: i32, %arg2: memref<1x2x128xf32, #tpu.memory_space<vmem>>, %arg3: memref<2x128xf32, #tpu.memory_space<vmem>>, %arg4: memref<1x2x128xf32, #tpu.memory_space<vmem>>) attributes {dimension_semantics = [#tpu.dimension_semantics<parallel>, #tpu.dimension_semantics<parallel>], iteration_bounds = array<i64: 1, 2>, scalar_prefetch = 0 : i64, scratch_operands = 0 : i64, tpu.core_type = #tpu.core_type<tc>, window_params = [{transform_indices = @transform_0, window_bounds = array<i64: 1, 2, 128>}, {transform_indices = @transform_1, window_bounds = array<i64: 2, 128>}, {transform_indices = @transform_2, window_bounds = array<i64: 1, 2, 128>}]} {
    %c0 = arith.constant 0 : index
    %c0_0 = arith.constant 0 : index
    %c0_1 = arith.constant 0 : index
    %0 = vector.load %arg2[%c0, %c0_0, %c0_1] : memref<1x2x128xf32, #tpu.memory_space<vmem>>, vector<1x2x128xf32>
    %1 = vector.shape_cast %0 : vector<1x2x128xf32> to vector<2x128xf32>
    %c0_2 = arith.constant 0 : index
    %c0_3 = arith.constant 0 : index
    %2 = vector.load %arg3[%c0_2, %c0_3] : memref<2x128xf32, #tpu.memory_space<vmem>>, vector<2x128xf32>
    %3 = arith.addf %1, %2 : vector<2x128xf32>
    %c0_4 = arith.constant 0 : index
    %c0_5 = arith.constant 0 : index
    %c0_6 = arith.constant 0 : index
    %4 = vector.load %arg4[%c0_4, %c0_5, %c0_6] : memref<1x2x128xf32, #tpu.memory_space<vmem>>, vector<1x2x128xf32>
    %5 = vector.shape_cast %4 : vector<1x2x128xf32> to vector<2x128xf32>
    %6 = vector.shape_cast %3 : vector<2x128xf32> to vector<1x2x128xf32>
    tpu.vector_store %arg4[%c0_4, %c0_5, %c0_6], %6 {strides = array<i32>} : memref<1x2x128xf32, #tpu.memory_space<vmem>>, vector<1x2x128xf32>,
    return
  }
  func.func @transform_0(%arg0: i32, %arg1: i32) -> (i32, i32, i32) {
    %c0_i32 = arith.constant 0 : i32
    %c0_i32_0 = arith.constant 0 : i32
    return %arg1, %arg0, %c0_i32 : i32, i32, i32
  }
  func.func @transform_1(%arg0: i32, %arg1: i32) -> (i32, i32) {
    %c0_i32 = arith.constant 0 : i32
    %c0_i32_0 = arith.constant 0 : i32
    return %arg0, %c0_i32 : i32, i32
  }
  func.func @transform_2(%arg0: i32, %arg1: i32) -> (i32, i32, i32) {
    %c0_i32 = arith.constant 0 : i32
    %c0_i32_0 = arith.constant 0 : i32
    return %arg1, %arg0, %c0_i32 : i32, i32, i32
  }
}

</mosaic_0001>

<bundles_post_ra>
// kernel: tpu_custom_call.1
= control target key start
LH: loop header
LB: loop body
LE: loop exit
PB: predicated region body
PF: predicated region fallthrough
CT: control target
= control target key end

     0   :  { %7 = vsyncpa [#allocation3], 0  ;;  %s714_s0 = inlined_call_operand.hbm [shape: f32[2,2,128], index: 0, kind: input, shape index: {}]   ;;  %s715_s1 = inlined_call_operand.hbm [shape: f32[2,128], index: 1, kind: input, shape index: {}]   ;;  %s716_s2 = inlined_call_operand.hbm [shape: f32[2,2,128], index: 2, kind: output, shape index: {}]  }
   0x1   :  { %9 = vsyncpa [#allocation3 + $0x1], 0 }
   0x2   :  { %10 = vsyncpa [#allocation6], 0 }
   0x3   :  { %11 = vsyncpa [#allocation4], 0 }
   0x4   :  { %13 = vsyncpa [#allocation4 + $0x1], 0  ;;  %s565_s9 = smov 0   ;;  %s567_s10 = smov 0  }
   0x5   :  { %s569_s11 = smov 0   ;;  %s571_s12 = smov 0  }
   0x6   :  { %s573_s13 = smov 0   ;;  %s575_s14 = smov 0  }
   0x7 LB: > { %s313_s15 = sadd.s32 4294967295, %s547_s14   ;;  %s314_s16 = sadd.s32 4294967294, %s547_s14   ;;  %s547_s14 = sphi %s575_s14, %s19_s14   ;;  %s543_s13 = sphi %s573_s13, %s728_s13   ;;  %s539_s12 = sphi %s571_s12, %s727_s12   ;;  %s535_s11 = sphi %s569_s11, %s726_s11   ;;  %s531_s10 = sphi %s567_s10, %s725_s10   ;;  %s527_s9 = sphi %s565_s9, %s724_s9  }
   0x8   : > { %p53_p0 = scmp.ne.s32.totalorder %s531_s10, %s527_s9  ;;  %p599_p1 = scmp.eq.s32.totalorder %s313_s15, 0 }
   0x9   : > { %p603_p2 = scmp.eq.s32.totalorder %s313_s15, 1  ;;  %p111_p3 = scmp.eq.s32.totalorder %s314_s16, 1 }
   0xa   : > { %p609_p4 = por %p599_p1, %p53_p0  ;;  %p315_p5 = scmp.ge.s32.totalorder %s547_s14, 1 }
   0xb   : > { %p614_p6 = por %p111_p3, %p53_p0  ;;  %p118_p7 = scmp.lt.s32.totalorder %s547_s14, 3 }
   0xc   : > { %s132_s23 = sshll.u32 %s715_s1, 4  ;;  %p317_p9 = scmp.ge.s32.totalorder %s547_s14, 2  ;;  %s133_s23 = int_to_ptr.hbm [resolvable:$true] %s132_s23 }
   0xd   : > { %p622_p8 = pnand %p315_p5, %p118_p7  ;;  %s549_s25 = smov [#allocation5]  }
   0xe   : > { %s134_s26 = sshll.u32 %s549_s25, 4  ;;  %s28_s27 = sadd.s32 1, %s543_s13  ;;  %s135_s26 = int_to_ptr.vmem [resolvable:$true] %s134_s26 }
   0xf   : > { %p336_p10 = pneg %p622_p8  ;;  %p29_p12 = scmp.ge.s32.totalorder %s28_s27, 2 }
  0x10   : > { %s40_s28 = sadd.s32 1, %s535_s11  ;;  %p47_p13 = scmp.ne.s32.totalorder %s535_s11, %s531_s10 }
  0x11   : > { %p337_p11 = pnand %p336_p10, %p599_p1  ;;  %p48_p0 = scmp.eq.s32.totalorder %s547_s14, 0 }
  0x12   : > { %s730_s27 = smov (%p29_p12, %s28_s27), 0  ;;  %p644_p5 = por %p603_p2, %p47_p13 }
  0x13   : > { %339 = dma.hbm_to_vmem [thread:$0]  (!%p337_p11), %s133_s23, 32, %s135_s26, [#allocation6]  }
  0x14   : > { %p638_p3 = por %p48_p0, %p47_p13  ;;  %s35_s3 = ssub.s32 %s543_s13, %s730_s27 }
  0x15   : > { %p349_p7 = scmp.lt.s32.totalorder %s547_s14, 2  ;;  %p38_p10 = scmp.eq.s32.totalorder %s35_s3, 0 }
  0x16   : > { %s145_s4 = sand.u32 1, %s535_s11   ;;  %s319_s7 = sshll.u32 %s543_s13, 1 }
  0x17   : > { %s318_s5 = sshll.u32 %s145_s4, 1  ;;  %s154_s16 = scalar_lea.hbm %s714_s0, %s319_s7 }
  0x18   : > { %s653_s6 = scalar_select %p38_p10, %s535_s11, %s40_s28  }
  0x19   : > { %s149_s21 = scalar_lea.vmem [#allocation2], %s318_s5  ;;  %s156_s18 = sshll.u32 %s154_s16, 4  ;;  %s157_s18 = int_to_ptr.hbm [resolvable:$true] %s156_s18 }
  0x1a   : > { %s158_s22 = sshll.u32 %s149_s21, 4  ;;  %p341_p2 = pnand %p349_p7, %p638_p3  ;;  %s159_s22 = int_to_ptr.vmem [resolvable:$true] %s158_s22 }
  0x1b   : > { %s146_s23 = scalar_lea.sflag [#allocation3], %s145_s4  ;;  %167 = sbr.rel (%p622_p8) target bundleno = 50 (0x32), region = 28 }
  0x1c   : > { %343 = dma.hbm_to_vmem [thread:$0]  (!%p341_p2), %s157_s18, 32, %s159_s22, %s146_s23  }
  0x1d   : > { %s664_s25 = sand.u32 (!%p622_p8), 1, %s531_s10  }
  0x1e   : > { %s321_s26 = sshll.u32 (!%p622_p8), %s664_s25, 1  ;;  %s170_s28 = scalar_lea.sflag (!%p622_p8), [#allocation3], %s664_s25 }
  0x1f   : > { %s173_s3 = scalar_lea.vmem (!%p622_p8), [#allocation2], %s321_s26 }
  0x20   : > { %514 = dma.done.wait (%p609_p4), %s170_s28, 32  }
  0x21   : > { %516 = vsyncadd (%p609_p4), %s170_s28, 4294967264 }
  0x22   : > { %518 = dma.done.wait (%p599_p1), [#allocation6], 32  }
  0x23   : > { %520 = vsyncadd (%p599_p1), [#allocation6], 4294967264  ;;  %s325_s24 = sshll.u32 %s539_s12, 1  ;;  %s199_s7 = scalar_lea.vmem [#allocation7], %s321_s26  ;;  %v200_v0 = vld [vmem:[%s173_s3] sm:$0x3] }
  0x24   : > { %s216_s5 = scalar_lea.hbm %s716_s2, %s325_s24  ;;  %s218_s8 = sshll.u32 %s199_s7, 4  ;;  %v201_v1 = vld [vmem:[#allocation5] sm:$0x3]  ;;  %s219_s8 = int_to_ptr.vmem [resolvable:$true] %s218_s8 }
  0x25   : > { %s220_s15 = sshll.u32 %s216_s5, 4  ;;  %v202_v2 = vadd.f32 %v201_v1, %v200_v0  ;;  %s205_s19 = scalar_lea.sflag [#allocation4], %s664_s25  ;;  %s221_s15 = int_to_ptr.hbm [resolvable:$true] %s220_s15 }
  0x26   : > { %s475_s17 = sshra.s32 %s221_s15, 4  ;;  %s481_s22 = scalar_lea.hbm %s716_s2, 4  ;;  %s476_s17 = int_to_ptr.hbm [resolvable:$true] %s475_s17 }
  0x27   : > { %203 = vst [vmem:[%s199_s7] sm:$0x3] %v202_v2  ;;  %s477_s16 = scalar_lea.hbm %s476_s17, 2  ;;  %p482_p11 = scmp.lt.s32.totalorder %s476_s17, %s716_s2 }
  0x28   : > { %p478_p1 = scmp.ne.s32.totalorder %s476_s17, %s477_s16  ;;  %p483_p12 = scmp.lt.s32.totalorder %s481_s22, %s477_s16 }
  0x2a   : > { %p479_p4 = pnand %p478_p1, %p644_p5  ;;  %p484_p13 = por %p483_p12, %p482_p11 }
  0x2c   : > { %p480_p8 = pneg %p479_p4 }
  0x2e   : > { %p485_p0 = pnand %p484_p13, %p480_p8 }
  0x30   : > { %488 = shalt.err (!%p485_p0)
}
  0x31   : > { %334 = dma.vmem_to_hbm [thread:$0]  (%p644_p5), %s219_s8, 32, %s221_s15, %s205_s19  }
  0x32 PF: > { %s232_s25 = sand.u32 1, %s527_s9   ;;  %p345_p3 = pnand %p317_p9, %p614_p6 }
  0x33   : > { %s233_s26 = scalar_lea.sflag [#allocation4], %s232_s25 }
  0x34   : > { %p346_p7 = pneg %p345_p3 }
  0x36   : > { %522 = dma.done.wait (%p346_p7), %s233_s26, 32  }
  0x37   : > { %524 = vsyncadd (%p346_p7), %s233_s26, 4294967264  ;;  %s19_s14 = sadd.s32 1, %s547_s14   ;;  %s724_s9 = smov %s531_s10 }
  0x38   : > { %p16_p10 = scmp.ge.s32.totalorder %s19_s14, 4   ;;  %s725_s10 = smov %s535_s11 }
  0x39   : > { %s726_s11 = smov %s653_s6  ;;  %s727_s12 = smov %s543_s13 }
  0x3a   : > { %s728_s13 = smov %s730_s27  ;;  %18 = sbr.rel (!%p16_p10) target bundleno = 7 (0x7), region = 78 }
  0x3f   :  { %239 = vsyncpa [#allocation3], 1 }
  0x40   :  { %241 = vsyncpa [#allocation3 + $0x1], 1 }
  0x41   :  { %242 = vsyncpa [#allocation6], 1 }
  0x42   :  { %243 = vsyncpa [#allocation4], 1 }
  0x43   :  { %245 = vsyncpa [#allocation4 + $0x1], 1 }

</bundles_post_ra>
